<compile_context>
chip_gen: v6e
topology: v6e:2x2x1
jax: 0.10.0
libtpu: 0.0.40
codegen_flags: <defaults>
</compile_context>

<pallas_src>
import functools

import jax
import jax.numpy as jnp
from jax.experimental import pallas as pl
from jax.experimental.pallas import tpu as pltpu


def _gaussian_noise_kernel(x_ref, noise_ref, o_ref, *, sigma):
    # Fused elementwise: out = x + (sigma * x) * noise, computed in f32.
    x = x_ref[...].astype(jnp.float32)
    noise = noise_ref[...]
    out = x + (sigma * x) * noise
    o_ref[...] = out.astype(o_ref.dtype)


def _choose_lane_width(total):
    """Largest lane width (multiple of 128) that divides the element count."""
    for lane in (4096, 2048, 1024, 512, 256, 128):
        if total % lane == 0:
            return lane
    return None


def _choose_row_tile(rows, cols, itemsize=4, target_bytes=1 << 20):
    """Largest multiple-of-8 divisor of `rows` with tile size <= target_bytes."""
    if rows <= 8:
        return rows
    max_tm = max(8, target_bytes // max(1, cols * itemsize))
    best = None
    tm = 8
    while tm <= min(rows, max_tm):
        if rows % tm == 0:
            best = tm
        tm += 8
    return best if best is not None else rows


def gaussian_noise(x, key, *, sigma=0.1, training=True, is_relative_detach=True):
    """Pallas implementation of GaussianNoise.forward.

    x:   (N, C, H, W) activations (any float dtype)
    key: jax.random PRNG key used to draw the standard-normal noise
    """
    # is_relative_detach only changes gradient flow in torch; forward value is
    # identical, so it is a no-op here.
    del is_relative_detach

    if (not training) or sigma == 0:
        return x

    orig_shape = x.shape
    total = int(x.size)

    # Lane-dense 2-D slab; fall back to a single full-extent row if the element
    # count is not a multiple of 128 (block == full array dims is always legal).
    lane = _choose_lane_width(total)
    if lane is None:
        rows, cols = 1, total
    else:
        cols = lane
        rows = total // lane

    x2 = x.reshape(rows, cols)
    noise = jax.random.normal(key, (rows, cols), dtype=jnp.float32)

    # Row tile sized so 2 inputs + 1 output, double buffered, stay well inside
    # the smallest scoped-VMEM default (16 MiB on v5e; 32 MiB on v6e/v7x).
    tm = _choose_row_tile(rows, cols, itemsize=4)
    if rows % tm != 0:
        tm = rows
    n_blocks = rows // tm

    kernel = functools.partial(_gaussian_noise_kernel, sigma=float(sigma))

    out2 = pl.pallas_call(
        kernel,
        out_shape=jax.ShapeDtypeStruct((rows, cols), x.dtype),
        grid=(n_blocks,),
        in_specs=[
            pl.BlockSpec((tm, cols), lambda i: (i, 0)),
            pl.BlockSpec((tm, cols), lambda i: (i, 0)),
        ],
        out_specs=pl.BlockSpec((tm, cols), lambda i: (i, 0)),
        compiler_params=pltpu.CompilerParams(
            # Elementwise, no cross-tile dependence: shard across TCs on v7x.
            dimension_semantics=("parallel",),
        ),
    )(x2, noise)

    return out2.reshape(orig_shape)


if __name__ == "__main__":
    root = jax.random.PRNGKey(0)
    kx, kn = jax.random.split(root)

    x = jax.random.normal(kx, (2, 4, 16, 16), dtype=jnp.float32)

    # Training-mode forward (noise applied).
    y = gaussian_noise(x, kn, sigma=0.1, training=True)
    y = jax.block_until_ready(y)
    assert y.shape == x.shape and y.dtype == x.dtype

    # Eval-mode forward is the identity.
    y_eval = gaussian_noise(x, kn, sigma=0.1, training=False)
    assert jnp.array_equal(y_eval, x)

    # Exact reference: same noise draw (same key, same slab layout).
    total = int(x.size)
    lane = _choose_lane_width(total)
    rows, cols = (1, total) if lane is None else (total // lane, lane)
    noise_ref = jax.random.normal(kn, (rows, cols), dtype=jnp.float32).reshape(x.shape)
    y_ref = x + (0.1 * x) * noise_ref
    assert bool(jnp.allclose(y, y_ref, atol=1e-6, rtol=1e-6))

    # Sanity: relative perturbation magnitude should be on the order of sigma.
    rel = jnp.abs(y - x) / (jnp.abs(x) + 1e-8)
    assert float(jnp.mean(rel)) < 1.0

    print("KERNEL_OK")
</pallas_src>

<mosaic_0001>
module attributes {stable_mosaic.version = 11 : i64} {
  func.func @_gaussian_noise_kernel(%arg0: i32, %arg1: memref<1x2048xf32, #tpu.memory_space<vmem>>, %arg2: memref<1x2048xf32, #tpu.memory_space<vmem>>, %arg3: memref<1x2048xf32, #tpu.memory_space<vmem>>) attributes {dimension_semantics = [#tpu.dimension_semantics<parallel>], iteration_bounds = array<i64: 1>, scalar_prefetch = 0 : i64, scratch_operands = 0 : i64, tpu.core_type = #tpu.core_type<tc>, window_params = [{transform_indices = @transform_0, window_bounds = array<i64: 1, 2048>}, {transform_indices = @transform_1, window_bounds = array<i64: 1, 2048>}, {transform_indices = @transform_2, window_bounds = array<i64: 1, 2048>}]} {
    %c0 = arith.constant 0 : index
    %c0_0 = arith.constant 0 : index
    %0 = vector.load %arg1[%c0, %c0_0] : memref<1x2048xf32, #tpu.memory_space<vmem>>, vector<1x2048xf32>
    %c0_1 = arith.constant 0 : index
    %c0_2 = arith.constant 0 : index
    %1 = vector.load %arg2[%c0_1, %c0_2] : memref<1x2048xf32, #tpu.memory_space<vmem>>, vector<1x2048xf32>
    %cst = arith.constant 1.000000e-01 : f32
    %2 = vector.broadcast %cst : f32 to vector<1x2048xf32>
    %3 = arith.mulf %2, %0 : vector<1x2048xf32>
    %4 = arith.mulf %3, %1 : vector<1x2048xf32>
    %5 = arith.addf %0, %4 : vector<1x2048xf32>
    %c0_3 = arith.constant 0 : index
    %c0_4 = arith.constant 0 : index
    %6 = vector.load %arg3[%c0_3, %c0_4] : memref<1x2048xf32, #tpu.memory_space<vmem>>, vector<1x2048xf32>
    tpu.vector_store %arg3[%c0_3, %c0_4], %5 {strides = array<i32>} : memref<1x2048xf32, #tpu.memory_space<vmem>>, vector<1x2048xf32>,
    return
  }
  func.func @transform_0(%arg0: i32) -> (i32, i32) {
    %c0_i32 = arith.constant 0 : i32
    %c0_i32_0 = arith.constant 0 : i32
    return %arg0, %c0_i32 : i32, i32
  }
  func.func @transform_1(%arg0: i32) -> (i32, i32) {
    %c0_i32 = arith.constant 0 : i32
    %c0_i32_0 = arith.constant 0 : i32
    return %arg0, %c0_i32 : i32, i32
  }
  func.func @transform_2(%arg0: i32) -> (i32, i32) {
    %c0_i32 = arith.constant 0 : i32
    %c0_i32_0 = arith.constant 0 : i32
    return %arg0, %c0_i32 : i32, i32
  }
}

</mosaic_0001>

<bundles_post_ra>
// kernel: tpu_custom_call.1
= control target key start
LH: loop header
LB: loop body
LE: loop exit
PB: predicated region body
PF: predicated region fallthrough
CT: control target
= control target key end

     0   :  { %7 = vsyncpa [#allocation3], 0  ;;  %s160_s0 = inlined_call_operand.hbm [shape: f32[1,2048], index: 0, kind: input, shape index: {}]   ;;  %s161_s1 = inlined_call_operand.hbm [shape: f32[1,2048], index: 1, kind: input, shape index: {}]   ;;  %s162_s2 = inlined_call_operand.hbm [shape: f32[1,2048], index: 2, kind: output, shape index: {}]  }
   0x1   :  { %8 = vsyncpa [#allocation6], 0 }
   0x2   :  { %9 = vsyncpa [#allocation4], 0  ;;  %s133_s9 = smov [#allocation2]   ;;  %s134_s11 = smov [#allocation5]  }
   0x3   :  { %s16_s10 = sshll.u32 %s133_s9, 4  ;;  %s26_s12 = sshll.u32 %s134_s11, 4  ;;  %s17_s10 = int_to_ptr.vmem [resolvable:$true] %s16_s10  ;;  %s27_s12 = int_to_ptr.vmem [resolvable:$true] %s26_s12 }
   0x4   :  { %s75_s13 = scalar_lea.vmem %s17_s10, 256  ;;  %p80_p1 = scmp.lt.s32.totalorder %s17_s10, %s17_s10 }
   0x5   :  { %p76_p0 = scmp.ne.s32.totalorder %s17_s10, %s75_s13  ;;  %p81_p2 = scmp.lt.s32.totalorder %s75_s13, %s75_s13 }
   0x7   :  { %p82_p3 = por %p81_p2, %p80_p1 }
   0x9   :  { %p83_p4 = pnand %p82_p3, %p76_p0 }
   0xb   :  { %86 = shalt.err (!%p83_p4)
}
   0xc   :  { %19 = dma.hbm_to_vmem [thread:$0]  %s160_s0, 256, %s17_s10, [#allocation3]  }
   0xd   :  { %s95_s16 = scalar_lea.vmem %s27_s12, 256  ;;  %p100_p6 = scmp.lt.s32.totalorder %s27_s12, %s27_s12 }
   0xe   :  { %p96_p5 = scmp.ne.s32.totalorder %s27_s12, %s95_s16  ;;  %p101_p7 = scmp.lt.s32.totalorder %s95_s16, %s95_s16 }
  0x10   :  { %p102_p8 = por %p101_p7, %p100_p6 }
  0x12   :  { %p103_p9 = pnand %p102_p8, %p96_p5 }
  0x14   :  { %106 = shalt.err (!%p103_p9)
}
  0x15   :  { %29 = dma.hbm_to_vmem [thread:$0]  %s161_s1, 256, %s27_s12, [#allocation6]  }
  0x16   :  { %127 = dma.done.wait [#allocation3], 256  }
  0x17   :  { %128 = vsyncadd [#allocation3], 4294967040 }
  0x18   :  { %129 = dma.done.wait [#allocation6], 256  }
  0x19   :  { %130 = vsyncadd [#allocation6], 4294967040  ;;  %v36_v0 = vld [vmem:[#allocation2] sm:$0xff]  ;;  %v38_v1 = vld [vmem:[#allocation5] sm:$0xff]  ;;  %s135_s0 = smov [#allocation7]  }
  0x1a   :  { %v37_v2 = vld [vmem:[#allocation2 + $0x8] sm:$0xff]  ;;  %v40_v3 = vmul.f32 0.1, %v36_v0  ;;  %v39_v4 = vld [vmem:[#allocation5 + $0x8] sm:$0xff]  ;;  %s54_s19 = sshll.u32 %s135_s0, 4  ;;  %s55_s19 = int_to_ptr.vmem [resolvable:$true] %s54_s19 }
  0x1b   :  { %v41_v5 = vmul.f32 0.1, %v37_v2  ;;  %s107_s1 = scalar_lea.vmem %s55_s19, 256  ;;  %p112_p11 = scmp.lt.s32.totalorder %s55_s19, %s55_s19 }
  0x1c   :  { %v42_v6 = vmul.f32 %v40_v3, %v38_v1  ;;  %p108_p10 = scmp.ne.s32.totalorder %s55_s19, %s107_s1  ;;  %p113_p12 = scmp.lt.s32.totalorder %s107_s1, %s107_s1 }
  0x1d   :  { %v43_v7 = vmul.f32 %v41_v5, %v39_v4 }
  0x1e   :  { %v44_v8 = vadd.f32 %v42_v6, %v36_v0  ;;  %p114_p13 = por %p113_p12, %p112_p11 }
  0x1f   :  { %v45_v9 = vadd.f32 %v43_v7, %v37_v2 }
  0x20   :  { %46 = vst [vmem:[#allocation7] sm:$0xff] %v44_v8  ;;  %p115_p0 = pnand %p114_p13, %p108_p10 }
  0x21   :  { %47 = vst [vmem:[#allocation7 + $0x8] sm:$0xff] %v45_v9 }
  0x22   :  { %118 = shalt.err (!%p115_p0)
}
  0x23   :  { %57 = dma.vmem_to_hbm [thread:$0]  %s55_s19, 256, %s162_s2, [#allocation4]  }
  0x24   :  { %131 = dma.done.wait [#allocation4], 256  }
  0x25   :  { %132 = vsyncadd [#allocation4], 4294967040 }
  0x26   :  { %61 = vsyncpa [#allocation3], 1 }
  0x27   :  { %62 = vsyncpa [#allocation6], 1 }
  0x28   :  { %63 = vsyncpa [#allocation4], 1 }

</bundles_post_ra>
